<compile_context>
chip_gen: v6e
topology: v6e:2x2x1
jax: 0.10.0
libtpu: 0.0.40
codegen_flags: <defaults>
</compile_context>

<pallas_src>
import jax
import jax.numpy as jnp
from jax import lax
from jax.experimental import pallas as pl
from jax.experimental.pallas import tpu as pltpu

# ----------------------------- model hyperparams -----------------------------
BLOCK_SIZE = 5      # context length
EMB_DIM = 4
VOCAB_SIZE = 27     # lowercase letters + '.'
HIDDEN_SIZE = 32
BATCH = 8

MAX_TILE = 2048     # rows per grid step (multiple of 8), amortizes ~0.35us/step overhead


# --------------------------------- kernel ------------------------------------
def nextchar_kernel(tok_ref, table_ref, w2_ref, b2_ref, o_ref):
    """logits = sin( onehot_flat(tok) @ T_flat ) @ W2 + b2

    tok_ref  : (TB, BLOCK_SIZE)                 int32
    table_ref: (BLOCK_SIZE*VOCAB, HIDDEN)       f32   (emb@W1 fold, b1/P folded in)
    w2_ref   : (HIDDEN, VOCAB)                  f32
    b2_ref   : (1, VOCAB)                       f32
    o_ref    : (TB, VOCAB)                      f32
    """
    tok = tok_ref[...]                                   # (TB, P)
    tb = tok.shape[0]

    # Flat one-hot (TB, P*V): 5 lane compares concatenated along lanes -> single matmul.
    vocab_iota = lax.broadcasted_iota(jnp.int32, (tb, VOCAB_SIZE), 1)
    pieces = [(vocab_iota == tok[:, p:p + 1]).astype(jnp.float32)
              for p in range(BLOCK_SIZE)]
    onehot = jnp.concatenate(pieces, axis=-1)            # (TB, 135)

    # One MXU pass replaces 5 tiny per-position matmuls; b1 is already folded into table.
    h = jnp.dot(onehot, table_ref[...], preferred_element_type=jnp.float32)  # (TB, H)
    h = jnp.sin(h)

    o = jnp.dot(h, w2_ref[...], preferred_element_type=jnp.float32) + b2_ref[...]
    o_ref[...] = o.astype(o_ref.dtype)


# ------------------------------ parameter prep --------------------------------
def prepare_nextchar_params(emb, w1, b1, w2, b2):
    """Fold embedding + b1 into a flat per-position table. Call ONCE per weight set.

    emb: (VOCAB, EMB_DIM), w1: (BLOCK_SIZE*EMB_DIM, HIDDEN)  (PyTorch lin1.weight.T)
    b1 : (1, HIDDEN) or (HIDDEN,)
    w2 : (HIDDEN, VOCAB)  (PyTorch lin2.weight.T),  b2: (1, VOCAB) or (VOCAB,)
    """
    table = jnp.einsum(
        "ve,peh->pvh", emb,
        w1.reshape(BLOCK_SIZE, EMB_DIM, HIDDEN_SIZE))               # (P, V, H)
    # Each flat one-hot row has exactly one 1 per position block -> adding b1/P to every
    # table row reproduces "+ b1" exactly after the matmul.
    table = table + jnp.reshape(b1, (1, 1, HIDDEN_SIZE)) / BLOCK_SIZE
    table_flat = table.reshape(BLOCK_SIZE * VOCAB_SIZE, HIDDEN_SIZE).astype(jnp.float32)
    w2f = jnp.asarray(w2, jnp.float32)                              # (H, V)
    b2f = jnp.reshape(jnp.asarray(b2, jnp.float32), (1, VOCAB_SIZE))
    return table_flat, w2f, b2f


def _round_up(x, m):
    return ((x + m - 1) // m) * m


def _pick_batch_tile(B):
    """Rows per grid step: multiple of 8, capped at MAX_TILE, >=2 steps for large B."""
    if B < 1024:
        return _round_up(B, 8)                       # single (or few) big step(s)
    # Large batch: guarantee >= 2 grid steps so both v7x TensorCores get work.
    return min(_round_up(pl.cdiv(B, 2), 8), MAX_TILE)


# -------------------------------- forward -------------------------------------
def nextchar_forward(tokens, params):
    """NextChar forward. tokens: (B, BLOCK_SIZE) int32 -> logits (B, VOCAB) f32."""
    table_flat, w2f, b2f = params
    B = tokens.shape[0]
    TB = _pick_batch_tile(B)
    grid = (pl.cdiv(B, TB),)                         # last partial block masked by Pallas

    return pl.pallas_call(
        nextchar_kernel,
        out_shape=jax.ShapeDtypeStruct((B, VOCAB_SIZE), jnp.float32),
        grid=grid,
        in_specs=[
            pl.BlockSpec((TB, BLOCK_SIZE), lambda i: (i, 0)),        # tokens: tiled batch
            pl.BlockSpec(table_flat.shape, lambda i: (0, 0)),        # weights resident
            pl.BlockSpec(w2f.shape, lambda i: (0, 0)),
            pl.BlockSpec(b2f.shape, lambda i: (0, 0)),
        ],
        out_specs=pl.BlockSpec((TB, VOCAB_SIZE), lambda i: (i, 0)),  # direct (B,V) write
        compiler_params=pltpu.CompilerParams(
            dimension_semantics=("parallel",)),                      # v7x: 2 TCs split batch
    )(tokens, table_flat, w2f, b2f)


# ------------------------------ reference (JAX) --------------------------------
def nextchar_reference(tokens, emb, w1, b1, w2, b2):
    x = jnp.take(emb, tokens, axis=0).reshape(tokens.shape[0], -1)
    h = jnp.sin(x @ w1 + b1)
    return h @ w2 + b2


# --------------------------------- main ----------------------------------------
if __name__ == "__main__":
    key = jax.random.PRNGKey(0)
    k_tok, k_emb, k_w1, k_b1, k_w2, k_b2 = jax.random.split(key, 6)

    tokens = jax.random.randint(
        k_tok, (BATCH, BLOCK_SIZE), 0, VOCAB_SIZE, dtype=jnp.int32)
    emb = jax.random.normal(k_emb, (VOCAB_SIZE, EMB_DIM), dtype=jnp.float32)
    in1 = BLOCK_SIZE * EMB_DIM
    # Stored as (in_features, out_features) = PyTorch weight transposed.
    w1 = jax.random.normal(k_w1, (in1, HIDDEN_SIZE), dtype=jnp.float32) * (1.0 / in1 ** 0.5)
    b1 = jax.random.normal(k_b1, (1, HIDDEN_SIZE), dtype=jnp.float32) * 0.1
    w2 = jax.random.normal(k_w2, (HIDDEN_SIZE, VOCAB_SIZE), dtype=jnp.float32) * (1.0 / HIDDEN_SIZE ** 0.5)
    b2 = jax.random.normal(k_b2, (1, VOCAB_SIZE), dtype=jnp.float32) * 0.1

    # Hoisted parameter prep (once per weight set), then the Pallas forward.
    params = prepare_nextchar_params(emb, w1, b1, w2, b2)
    params = jax.tree_util.tree_map(jax.block_until_ready, params)

    logits = nextchar_forward(tokens, params)
    jax.block_until_ready(logits)

    ref = nextchar_reference(tokens, emb, w1, b1, w2, b2)
    assert logits.shape == (BATCH, VOCAB_SIZE)
    assert jnp.allclose(logits, ref, atol=1e-4, rtol=1e-4), "mismatch vs reference"

    print("KERNEL_OK")
</pallas_src>

<mosaic_0001>
module attributes {stable_mosaic.version = 11 : i64} {
  func.func @nextchar_kernel(%arg0: i32, %arg1: memref<8x5xi32, #tpu.memory_space<vmem>>, %arg2: memref<135x32xf32, #tpu.memory_space<vmem>>, %arg3: memref<32x27xf32, #tpu.memory_space<vmem>>, %arg4: memref<1x27xf32, #tpu.memory_space<vmem>>, %arg5: memref<8x27xf32, #tpu.memory_space<vmem>>) attributes {dimension_semantics = [#tpu.dimension_semantics<parallel>], iteration_bounds = array<i64: 1>, scalar_prefetch = 0 : i64, scratch_operands = 0 : i64, tpu.core_type = #tpu.core_type<tc>, window_params = [{transform_indices = @transform_0, window_bounds = array<i64: 8, 5>}, {pipeline_mode = #tpu.pipeline_mode<synchronous>, transform_indices = @transform_1, window_bounds = array<i64: 135, 32>}, {pipeline_mode = #tpu.pipeline_mode<synchronous>, transform_indices = @transform_2, window_bounds = array<i64: 32, 27>}, {pipeline_mode = #tpu.pipeline_mode<synchronous>, transform_indices = @transform_3, window_bounds = array<i64: 1, 27>}, {transform_indices = @transform_4, window_bounds = array<i64: 8, 27>}]} {
    %c0 = arith.constant 0 : index
    %c0_0 = arith.constant 0 : index
    %0 = vector.load %arg1[%c0, %c0_0] : memref<8x5xi32, #tpu.memory_space<vmem>>, vector<8x5xi32>
    %1 = tpu.iota {dimensions = array<i32: 1>} : vector<8x27xi32>
    %2 = vector.extract_strided_slice %0 {offsets = [0, 0], sizes = [8, 1], strides = [1, 1]} : vector<8x5xi32> to vector<8x1xi32>
    %3 = vector.broadcast %2 : vector<8x1xi32> to vector<8x27xi32>
    %4 = arith.cmpi eq, %1, %3 : vector<8x27xi32>
    %5 = arith.extui %4 : vector<8x27xi1> to vector<8x27xi32>
    %6 = arith.sitofp %5 : vector<8x27xi32> to vector<8x27xf32>
    %7 = vector.extract_strided_slice %0 {offsets = [0, 1], sizes = [8, 1], strides = [1, 1]} : vector<8x5xi32> to vector<8x1xi32>
    %8 = vector.broadcast %7 : vector<8x1xi32> to vector<8x27xi32>
    %9 = arith.cmpi eq, %1, %8 : vector<8x27xi32>
    %10 = arith.extui %9 : vector<8x27xi1> to vector<8x27xi32>
    %11 = arith.sitofp %10 : vector<8x27xi32> to vector<8x27xf32>
    %12 = vector.extract_strided_slice %0 {offsets = [0, 2], sizes = [8, 1], strides = [1, 1]} : vector<8x5xi32> to vector<8x1xi32>
    %13 = vector.broadcast %12 : vector<8x1xi32> to vector<8x27xi32>
    %14 = arith.cmpi eq, %1, %13 : vector<8x27xi32>
    %15 = arith.extui %14 : vector<8x27xi1> to vector<8x27xi32>
    %16 = arith.sitofp %15 : vector<8x27xi32> to vector<8x27xf32>
    %17 = vector.extract_strided_slice %0 {offsets = [0, 3], sizes = [8, 1], strides = [1, 1]} : vector<8x5xi32> to vector<8x1xi32>
    %18 = vector.broadcast %17 : vector<8x1xi32> to vector<8x27xi32>
    %19 = arith.cmpi eq, %1, %18 : vector<8x27xi32>
    %20 = arith.extui %19 : vector<8x27xi1> to vector<8x27xi32>
    %21 = arith.sitofp %20 : vector<8x27xi32> to vector<8x27xf32>
    %22 = vector.extract_strided_slice %0 {offsets = [0, 4], sizes = [8, 1], strides = [1, 1]} : vector<8x5xi32> to vector<8x1xi32>
    %23 = vector.broadcast %22 : vector<8x1xi32> to vector<8x27xi32>
    %24 = arith.cmpi eq, %1, %23 : vector<8x27xi32>
    %25 = arith.extui %24 : vector<8x27xi1> to vector<8x27xi32>
    %26 = arith.sitofp %25 : vector<8x27xi32> to vector<8x27xf32>
    %27 = tpu.concatenate %6, %11, %16, %21, %26 in 1 : vector<8x27xf32>, vector<8x27xf32>, vector<8x27xf32>, vector<8x27xf32>, vector<8x27xf32> -> vector<8x135xf32>
    %c0_1 = arith.constant 0 : index
    %c0_2 = arith.constant 0 : index
    %28 = vector.load %arg2[%c0_1, %c0_2] : memref<135x32xf32, #tpu.memory_space<vmem>>, vector<135x32xf32>
    %cst = arith.constant dense<0.000000e+00> : vector<8x32xf32>
    %29 = tpu.matmul %27, %28, %cst {dimension_numbers = #tpu.dot_dimension_numbers<[1], [0], [0], [1], [0, 0, 1, 1], [], []>} : vector<8x135xf32>, vector<135x32xf32>, vector<8x32xf32> -> vector<8x32xf32>
    %30 = math.sin %29 : vector<8x32xf32>
    %c0_3 = arith.constant 0 : index
    %c0_4 = arith.constant 0 : index
    %31 = vector.load %arg3[%c0_3, %c0_4] : memref<32x27xf32, #tpu.memory_space<vmem>>, vector<32x27xf32>
    %cst_5 = arith.constant dense<0.000000e+00> : vector<8x27xf32>
    %32 = tpu.matmul %30, %31, %cst_5 {dimension_numbers = #tpu.dot_dimension_numbers<[1], [0], [0], [1], [0, 0, 1, 1], [], []>} : vector<8x32xf32>, vector<32x27xf32>, vector<8x27xf32> -> vector<8x27xf32>
    %c0_6 = arith.constant 0 : index
    %c0_7 = arith.constant 0 : index
    %33 = vector.load %arg4[%c0_6, %c0_7] : memref<1x27xf32, #tpu.memory_space<vmem>>, vector<1x27xf32>
    %34 = vector.broadcast %33 : vector<1x27xf32> to vector<8x27xf32>
    %35 = arith.addf %32, %34 : vector<8x27xf32>
    %c0_8 = arith.constant 0 : index
    %c0_9 = arith.constant 0 : index
    %36 = vector.load %arg5[%c0_8, %c0_9] : memref<8x27xf32, #tpu.memory_space<vmem>>, vector<8x27xf32>
    tpu.vector_store %arg5[%c0_8, %c0_9], %35 {strides = array<i32>} : memref<8x27xf32, #tpu.memory_space<vmem>>, vector<8x27xf32>,
    return
  }
  func.func @transform_0(%arg0: i32) -> (i32, i32) {
    %c0_i32 = arith.constant 0 : i32
    %c0_i32_0 = arith.constant 0 : i32
    return %arg0, %c0_i32 : i32, i32
  }
  func.func @transform_1(%arg0: i32) -> (i32, i32) {
    %c0_i32 = arith.constant 0 : i32
    %c0_i32_0 = arith.constant 0 : i32
    %c0_i32_1 = arith.constant 0 : i32
    return %c0_i32, %c0_i32_0 : i32, i32
  }
  func.func @transform_2(%arg0: i32) -> (i32, i32) {
    %c0_i32 = arith.constant 0 : i32
    %c0_i32_0 = arith.constant 0 : i32
    %c0_i32_1 = arith.constant 0 : i32
    return %c0_i32, %c0_i32_0 : i32, i32
  }
  func.func @transform_3(%arg0: i32) -> (i32, i32) {
    %c0_i32 = arith.constant 0 : i32
    %c0_i32_0 = arith.constant 0 : i32
    %c0_i32_1 = arith.constant 0 : i32
    return %c0_i32, %c0_i32_0 : i32, i32
  }
  func.func @transform_4(%arg0: i32) -> (i32, i32) {
    %c0_i32 = arith.constant 0 : i32
    %c0_i32_0 = arith.constant 0 : i32
    return %arg0, %c0_i32 : i32, i32
  }
}

</mosaic_0001>

<bundles_post_ra>
// kernel: tpu_custom_call.1
= control target key start
LH: loop header
LB: loop body
LE: loop exit
PB: predicated region body
PF: predicated region fallthrough
CT: control target
= control target key end

     0   :  { %v456_v1 = vmov 1   ;;  %v457_v2 = vmov 3   ;;  %s621_s0 = inlined_call_operand.vmem [shape: s32[8,5], index: 0, kind: input, shape index: {}]   ;;  %s622_s1 = inlined_call_operand.vmem [shape: f32[135,32], index: 1, kind: input, shape index: {}]   ;;  %s623_s2 = inlined_call_operand.vmem [shape: f32[32,27], index: 2, kind: input, shape index: {}]   ;;  %s624_s3 = inlined_call_operand.vmem [shape: f32[1,27], index: 3, kind: input, shape index: {}]   ;;  %s625_s4 = inlined_call_operand.hbm [shape: f32[8,27], index: 4, kind: output, shape index: {}]  }
   0x1   :  { %v18_v0 = vld [vmem:[%s621_s0] sm:$0xff]  ;;  %424 = vset.pattern.permute.xlu0 %v456_v1  ;;  %426 = vset.pattern.permute.xlu1 %v457_v2 }
   0x2   :  { %9 = vsyncpa [#allocation3], 0  ;;  %28 = vperm.xlu0 %424, %v18_v0   ;;  %40 = vperm.xlu1 %426, %v18_v0   ;;  %v458_v3 = vmov 0.0   ;;  %v459_v4 = vmov 2   ;;  %v460_v5 = vmov 4   ;;  %v90_v6 = vld [vmem:[%s622_s1 + $0x78] sm:$0xff]  ;;  %v19_v21 = vlaneseq }
   0x3   :  { %99 = vmatprep.subr.mxu0 %v458_v3  ;;  %391 = vmatprep.subr.mxu1 %v458_v3  ;;  %v89_v7 = vld [vmem:[%s622_s1 + $0x70] sm:$0xff]  ;;  %v461_v8 = vmov 0   ;;  %v88_v9 = vld [vmem:[%s622_s1 + $0x68] sm:$0xff]  ;;  %v87_v10 = vld [vmem:[%s622_s1 + $0x60] sm:$0xff]  ;;  %vm95_vm0 = vcmask 1046528   ;;  %s462_s23 = smov 27  }
   0x4   :  { %100 = vmatpush1.msra.mxu0 %v90_v6  ;;  %v86_v11 = vld [vmem:[%s622_s1 + $0x58] sm:$0xff]  ;;  %v85_v12 = vld [vmem:[%s622_s1 + $0x50] sm:$0xff]  ;;  %v84_v13 = vld [vmem:[%s622_s1 + $0x48] sm:$0xff]  ;;  %v20_v24 = vand.u32 127, %v19_v21  ;;  %s463_s24 = smov 81   ;;  %s465_s25 = smov 108  }
   0x5   :  { %101 = vmatprep.subr.mxu0 %v458_v3  ;;  %v83_v14 = vld [vmem:[%s622_s1 + $0x40] sm:$0xff]  ;;  %v82_v15 = vld [vmem:[%s622_s1 + $0x38] sm:$0xff]  ;;  %v81_v16 = vld [vmem:[%s622_s1 + $0x30] sm:$0xff]  ;;  %vm67_vm6 = vcmask 220160   ;;  %vm69_vm7 = vcmask 441344   ;;  %vm71_vm8 = vcmask 662528  }
   0x6   :  { %425 = vset.pattern.permute.xlu0 %v459_v4  ;;  %427 = vset.pattern.permute.xlu1 %v460_v5  ;;  %v80_v17 = vld [vmem:[%s622_s1 + $0x28] sm:$0xff]  ;;  %v79_v18 = vld [vmem:[%s622_s1 + $0x20] sm:$0xff]  ;;  %v78_v19 = vld [vmem:[%s622_s1 + $0x18] sm:$0xff]  ;;  %vm92_vm9 = vcmask 56320   ;;  %vm73_vm10 = vcmask 883712   ;;  %vm466_vm11 = vmmov 0  }
   0x7   :  { %34 = vperm.xlu0 %425, %v18_v0   ;;  %46 = vperm.xlu1 %427, %v18_v0   ;;  %v77_v20 = vld [vmem:[%s622_s1 + $0x10] sm:$0xff]  ;;  %v76_v22 = vld [vmem:[%s622_s1 + $0x8] sm:$0xff]  ;;  %v75_v23 = vld [vmem:[%s622_s1] sm:$0xff]  ;;  %v467_v60 = vmov 683565275   ;;  %s473_s9 = smov [#allocation2]  }
   0x8   :  { %102 = vmatpush1.msra.mxu0 %v89_v7  ;;  %v91_v25 = vld [vmem:[%s622_s1 + $0x80] sm:$0x7f]  ;;  %s464_s1 = smov 54   ;;  %v276_v44 = vld [vmem:[%s623_s2 + $0x18] sm:$0xff]  ;;  %v275_v45 = vld [vmem:[%s623_s2 + $0x10] sm:$0xff]  ;;  %399 = vmatprep.mubr.msk.f32.mxu1 %vm466_vm11, %v458_v3  ;;  %s365_s10 = sshll.u32 %s473_s9, 4  ;;  %s366_s10 = int_to_ptr.vmem [resolvable:$true] %s365_s10 }
   0x9   :  { %103 = vmatprep.subr.mxu0 %v458_v3  ;;  %392 = vmatpush3.msra.mxu1 %v276_v44  ;;  %v274_v46 = vld [vmem:[%s623_s2 + $0x8] sm:$0xff]  ;;  %v273_v47 = vld [vmem:[%s623_s2] sm:$0xff]  ;;  %v468_v62 = vmov 2475754826   ;;  %v469_v1 = vmov 2131351028   ;;  %p439_p1 = scmp.lt.s32.totalorder %s366_s10, %s366_s10 }
   0xa   :  { %104 = vmatpush1.msra.mxu0 %v88_v9  ;;  %393 = vmatprep.subr.mxu1 %v458_v3  ;;  %v470_v4 = vmov 2102212464   ;;  %v471_v7 = vmov 920167782   ;;  %s434_s11 = scalar_lea.vmem %s366_s10, 128 }
   0xb   :  { %428 = vset.pattern.permute.xlu1 %v461_v8  ;;  %429 = vset.pattern.permute.xlu0 %v460_v5  ;;  %p435_p0 = scmp.ne.s32.totalorder %s366_s10, %s434_s11  ;;  %p440_p2 = scmp.lt.s32.totalorder %s434_s11, %s434_s11 }
   0xc   :  { %22 = vperm.xlu1 %428, %v18_v0   ;;  %105 = vmatprep.subr.mxu0 %v458_v3 }
   0xd   :  { %106 = vmatpush1.msra.mxu0 %v87_v10  ;;  %394 = vmatpush3.msra.mxu1 %v275_v45  ;;  %v472_v10 = vmov 1326507024   ;;  %p441_p3 = por %p440_p2, %p439_p1 }
   0xe   :  { %107 = vmatprep.subr.mxu0 %v458_v3  ;;  %395 = vmatprep.subr.mxu1 %v458_v3 }
   0xf   :  { %108 = vmatpush1.msra.mxu0 %v86_v11  ;;  %396 = vmatpush3.msra.mxu1 %v274_v46  ;;  %p442_p4 = pnand %p441_p3, %p435_p0 }
  0x10   :  { %109 = vmatprep.subr.mxu0 %v458_v3  ;;  %397 = vmatprep.subr.mxu1 %v458_v3 }
  0x11   :  { %110 = vmatpush1.msra.mxu0 %v85_v12  ;;  %398 = vmatpush3.msra.mxu1 %v273_v47 }
  0x12   :  { %111 = vmatprep.subr.mxu0 %v458_v3 }
  0x13   :  { %112 = vmatpush1.msra.mxu0 %v84_v13 }
  0x14   :  { %113 = vmatprep.subr.mxu0 %v458_v3 }
  0x15   :  { %114 = vmatpush1.msra.mxu0 %v83_v14 }
  0x16   :  { %115 = vmatprep.subr.mxu0 %v458_v3 }
  0x17   :  { %116 = vmatpush1.msra.mxu0 %v82_v15 }
  0x18   :  { %117 = vmatprep.subr.mxu0 %v458_v3 }
  0x19   :  { %118 = vmatpush1.msra.mxu0 %v81_v16 }
  0x1a   :  { %119 = vmatprep.subr.mxu0 %v458_v3 }
  0x1b   :  { %120 = vmatpush1.msra.mxu0 %v80_v17 }
  0x1c   :  { %121 = vmatprep.subr.mxu0 %v458_v3 }
  0x1d   :  { %122 = vmatpush1.msra.mxu0 %v79_v18 }
  0x1e   :  { %123 = vmatprep.subr.mxu0 %v458_v3 }
  0x1f   :  { %124 = vmatpush1.msra.mxu0 %v78_v19 }
  0x20   :  { %125 = vmatprep.subr.mxu0 %v458_v3 }
  0x21   :  { %126 = vmatpush1.msra.mxu0 %v77_v20 }
  0x22   :  { %127 = vmatprep.subr.mxu0 %v458_v3 }
  0x23   :  { %128 = vmatpush1.msra.mxu0 %v76_v22 }
  0x24   :  { %129 = vmatprep.subr.mxu0 %v458_v3 }
  0x25   :  { %130 = vmatpush1.msra.mxu0 %v75_v23 }
  0x26   :  { %161 = vmatprep.subr.mxu0 %v458_v3 }
  0x27   :  { %378 = vmatpush2.msk.msra.mxu0 %vm95_vm0, %v91_v25 }
  0x7d   :  { %v29_v26 = vpop.permute.xlu0 %28  ;;  %v41_v27 = vpop.permute.xlu1 %40 }
  0x7e   :  { %vm30_vm1 = vcmp.eq.s32.totalorder %v20_v24, %v29_v26  ;;  %vm42_vm2 = vcmp.eq.s32.totalorder %v20_v24, %v41_v27 }
  0x7f   :  { %v374_v28 = vsel %vm30_vm1, 1.0, %v458_v3  ;;  %v376_v29 = vsel %vm42_vm2, 1.0, %v458_v3 }
  0x80   :  { %52 = vrot.lane.b32.xlu0 %v374_v28, %s462_s23 }
  0x82   :  { %v35_v30 = vpop.permute.xlu0 %34  ;;  %v47_v31 = vpop.permute.xlu1 %46 }
  0x83   :  { %vm36_vm3 = vcmp.eq.s32.totalorder %v20_v24, %v35_v30  ;;  %vm48_vm4 = vcmp.eq.s32.totalorder %v20_v24, %v47_v31 }
  0x84   :  { %v375_v32 = vsel %vm36_vm3, 1.0, %v458_v3  ;;  %60 = vrot.lane.b32.xlu0 %v376_v29, %s463_s24  ;;  %v377_v33 = vsel %vm48_vm4, 1.0, %v458_v3 }
  0x85   :  { %56 = vrot.lane.b32.xlu1 %v375_v32, %s464_s1 }
  0x87   :  { %v23_v34 = vpop.permute.xlu1 %22 }
  0x88   :  { %vm24_vm5 = vcmp.eq.s32.totalorder %v20_v24, %v23_v34 }
  0x89   :  { %64 = vrot.lane.b32.xlu1 %v377_v33, %s465_s25  ;;  %v373_v35 = vsel %vm24_vm5, 1.0, %v458_v3 }
  0xf2   :  { %v53_v36 = vpop.permute.xlu0 %52 }
  0xf3   :  { %v68_v37 = vsel %vm67_vm6, %v373_v35, %v53_v36 }
  0xf6   :  { %v61_v40 = vpop.permute.xlu0 %60 }
  0xf7   :  { %v57_v38 = vpop.permute.xlu1 %56 }
  0xf8   :  { %v70_v39 = vsel %vm69_vm7, %v68_v37, %v57_v38 }
  0xf9   :  { %v72_v42 = vsel %vm71_vm8, %v70_v39, %v61_v40 }
  0xfb   :  { %v65_v41 = vpop.permute.xlu1 %64 }
  0xfc   :  { %379 = vmatprep.mubr.msk.f32.mxu0 %vm92_vm9, %v65_v41  ;;  %v74_v43 = vsel %vm73_vm10, %v72_v42, %v65_v41  ;;  %vm284_vm9 = vcmask 261120  }
  0xfd   :  { %164 = vmatmul.mubr.f32.vlgmr.msra.gmra.mxu0 %v74_v43 }
 0x1bd   :  { %v593_v48 = vpop.f32.mrf.mxu0 }
 0x1be   :  { %v172_v49 = vand.u32 2139095040, %v593_v48  ;;  %v169_v54 = vand.u32 2147483647, %v593_v48  ;;  %vm171_vm3 = vcmp.lt.s32.totalorder %v593_v48, 0  ;;  %vm261_vm10 = vweird.f32 %v593_v48 }
 0x1bf   :  { %v167_v50 = vpop.f32.mrf.mxu0 }
 0x1c0   :  { %v173_v51 = vshrl.u32 %v172_v49, 23  ;;  %v176_v57 = vand.u32 8388607, %v169_v54  ;;  %vm170_vm4 = vcmp.le.f32.partialorder %v169_v54, 0.7853982 }
 0x1c2   :  { %v380_v52 = vadd.s32 4294967169, %v173_v51  ;;  %v177_v12 = vor.u32 8388608, %v176_v57 }
 0x1c4   :  { %v179_v53 = vadd.s32 1, %v380_v52  ;;  %v217_v26 = vshll.u32 %v177_v12, 8 }
 0x1c6   :  { %vm180_vm12 = vcmp.gt.s32.totalorder %v179_v53, 0 }
 0x1c7   :  { %v181_v55 = vsel %vm180_vm12, %v179_v53, 0 }
 0x1c8   :  { %v183_v56 = vand.u32 31, %v181_v55  ;;  %v182_v59 = vshrl.u32 %v181_v55, 5 }
 0x1ca   :  { %v184_v58 = vsub.s32 32, %v183_v56  ;;  %v186_v61 = vshll.u32 %v467_v60, %v183_v56  ;;  %v189_v63 = vshll.u32 %v468_v62, %v183_v56  ;;  %v192_v3 = vshll.u32 %v469_v1, %v183_v56 }
 0x1cb   :  { %v195_v6 = vshll.u32 %v470_v4, %v183_v56  ;;  %v198_v9 = vshll.u32 %v471_v7, %v183_v56  ;;  %vm201_vm13 = vcmp.lt.s32.totalorder %v182_v59, 1  ;;  %vm204_vm14 = vcmp.lt.s32.totalorder %v182_v59, 4 }
 0x1cc   :  { %v187_v0 = vshrl.u32 %v468_v62, %v184_v58  ;;  %v190_v2 = vshrl.u32 %v469_v1, %v184_v58  ;;  %v193_v5 = vshrl.u32 %v470_v4, %v184_v58  ;;  %v196_v8 = vshrl.u32 %v471_v7, %v184_v58 }
 0x1cd   :  { %v199_v11 = vshrl.u32 %v472_v10, %v184_v58  ;;  %v185_v21 = vshrl.u32 %v467_v60, %v184_v58  ;;  %vm203_vm15 = vcmp.lt.s32.totalorder %v182_v59, 3  ;;  %vm202_vm0 = vcmp.lt.s32.totalorder %v182_v59, 2 }
 0x1ce   :  { %v188_v13 = vor.u32 %v187_v0, %v186_v61  ;;  %v191_v14 = vor.u32 %v190_v2, %v189_v63  ;;  %v194_v15 = vor.u32 %v193_v5, %v192_v3  ;;  %v197_v16 = vor.u32 %v196_v8, %v195_v6 }
 0x1cf   :  { %v200_v17 = vor.u32 %v199_v11, %v198_v9 }
 0x1d0   :  { %v206_v18 = vsel %vm204_vm14, %v194_v15, 2102212464  ;;  %v209_v19 = vsel %vm201_vm13, %v188_v13, %v191_v14  ;;  %v213_v20 = vsel %vm201_vm13, %v191_v14, %v194_v15  ;;  %v210_v22 = vsel %vm204_vm14, %v197_v16, 920167782 }
 0x1d1   :  { %v214_v23 = vsel %vm204_vm14, %v200_v17, 1326507024  ;;  %v211_v24 = vsel %vm203_vm15, %v194_v15, %v210_v22  ;;  %v205_v27 = vsel %vm201_vm13, %v185_v21, %v188_v13  ;;  %v207_v28 = vsel %vm203_vm15, %v191_v14, %v206_v18  ;;  %v384_v14 = vld [vmem:[%s624_s3] ss:$0 sm:$0xff] }
 0x1d2   :  { %v215_v25 = vsel %vm203_vm15, %v197_v16, %v214_v23  ;;  %v212_v29 = vsel %vm202_vm0, %v209_v19, %v211_v24  ;;  %v208_v35 = vsel %vm202_vm0, %v205_v27, %v207_v28 }
 0x1d3   :  { %v216_v30 = vsel %vm202_vm0, %v213_v20, %v215_v25  ;;  %v602_v33 = vmul.u32.u64.low %v217_v26, %v212_v29  ;;  %v603_v34 = vmul.u32.u64.high %v217_v26, %v212_v29, %v602_v33  ;;  %v224_v37 = vmul.u32 %v217_v26, %v208_v35 }
 0x1d4   :  { %v599_v31 = vmul.u32.u64.low %v217_v26, %v216_v30  ;;  %v600_v32 = vmul.u32.u64.high %v217_v26, %v216_v30, %v599_v31 }
 0x1d5   :  { %v227_v36 = vadd.s32 1, %v603_v34 }
 0x1d6   :  { %vm226_vm1 = vc.u32 %v600_v32, %v602_v33  ;;  %v225_v50 = vadd.s32 %v602_v33, %v600_v32 }
 0x1d7   :  { %v228_v38 = vsel %vm226_vm1, %v227_v36, %v603_v34 }
 0x1d8   :  { %v229_v39 = vadd.s32 %v228_v38, %v224_v37 }
 0x1da   :  { %v230_v40 = vadd.s32 536870912, %v229_v39 }
 0x1dc   :  { %v231_v41 = vshrl.u32 %v230_v40, 30 }
 0x1de   :  { %v232_v42 = vshll.u32 %v231_v41, 30  ;;  %v255_v0 = vsub.s32 4, %v231_v41 }
 0x1e0   :  { %v233_v43 = vsub.s32 %v229_v39, %v232_v42  ;;  %v256_v3 = vsel %vm171_vm3, %v255_v0, %v231_v41 }
 0x1e1   :  { %v258_v4 = vsel %vm170_vm4, 0, %v256_v3 }
 0x1e2   :  { %v235_v44 = vsub.s32 0, %v233_v43  ;;  %v262_v5 = vadd.s32 3, %v258_v4 }
 0x1e4   :  { %v381_v45 = vmin.u32 %v235_v44, %v233_v43  ;;  %v263_v6 = vand.u32 3, %v262_v5 }
 0x1e6   :  { %v237_v46 = vclz %v381_v45  ;;  %vm268_vm5 = vcmp.eq.s32.totalorder %v263_v6, 2  ;;  %vm265_vm7 = vcmp.eq.s32.totalorder %v263_v6, 0  ;;  %vm264_vm8 = vcmp.lt.s32.totalorder %v263_v6, 2 }
 0x1e8   :  { %v382_v47 = vadd.s32 4294967294, %v237_v46 }
 0x1ea   :  { %vm383_vm2 = vcmp.lt.s32.totalorder %v382_v47, 0 }
 0x1eb   :  { %v240_v49 = vsel %vm383_vm2, 0, %v382_v47 }
 0x1ec   :  { %v241_v51 = vsub.s32 32, %v240_v49  ;;  %v245_v52 = vsub.s32 4294967266, %v240_v49  ;;  %v242_v53 = vshll.u32 %v233_v43, %v240_v49 }
 0x1ee   :  { %v243_v55 = vshrl.u32 %v225_v50, %v241_v51  ;;  %v246_v56 = vadd.s32 127, %v245_v52 }
 0x1f0   :  { %v244_v57 = vor.u32 %v243_v55, %v242_v53  ;;  %v247_v58 = vshll.u32 %v246_v56, 23 }
 0x1f2   :  { %v248_v59 = vor.u32 4788187, %v247_v58  ;;  %v251_v61 = vcvt.s32.f32 %v244_v57 }
 0x1f4   :  { %v249_v60 = vand.u32 2147483647, %v248_v59 }
 0x1f6   :  { %v252_v62 = vmul.f32 %v251_v61, %v249_v60 }
 0x1f8   :  { %v253_v63 = vxor.u32 2147483648, %v252_v62 }
 0x1fa   :  { %v254_v1 = vsel %vm171_vm3, %v253_v63, %v252_v62 }
 0x1fb   :  { %v257_v2 = vsel %vm170_vm4, %v593_v48, %v254_v1 }
 0x1fc   :  { %430 = vcosq.f32 %v257_v2 }
 0x1fd   :  { %432 = vsinq.f32 %v257_v2 }
 0x209   :  { %v431_v7 = vpop.eup %430 }
 0x20a   :  { %v433_v8 = vpop.eup %432  ;;  %v269_v9 = vxor.u32 2147483648, %v431_v7 }
 0x20b   :  { %v266_v10 = vxor.u32 2147483648, %v433_v8 }
 0x20c   :  { %v270_v11 = vsel %vm268_vm5, %v269_v9, %v433_v8 }
 0x20d   :  { %v267_v12 = vsel %vm265_vm7, %v431_v7, %v266_v10 }
 0x20e   :  { %v271_v54 = vsel %vm264_vm8, %v267_v12, %v270_v11 }
 0x20f   :  { %v272_v13 = vsel %vm261_vm10, nan, %v271_v54 }
 0x210   :  { %400 = vmatmul.mubr.msk.f32.vlgmr.msra.gmra.mxu1 %vm284_vm9, %v272_v13 }
 0x2d0   :  { %v354_v15 = vpop.f32.mrf.mxu1 }
 0x2d1   :  { %v355_v16 = vadd.f32 %v384_v14, %v354_v15 }
 0x2d2   :  { %v401_v17 = vpop.f32.mrf.mxu1 }
 0x2d3   :  { %358 = vst.msk [vmem:[#allocation2] sm:$0xff] %vm67_vm6, %v355_v16 }
 0x2d4   :  { %445 = shalt.err (!%p442_p4)
}
 0x2d5   :  { %368 = dma.vmem_to_hbm [thread:$0]  %s366_s10, 128, %s625_s4, [#allocation3]  }
 0x2d6   :  { %454 = dma.done.wait [#allocation3], 128  }
 0x2d7   :  { %455 = vsyncadd [#allocation3], 4294967168 }
 0x2d8   :  { %372 = vsyncpa [#allocation3], 1 }

</bundles_post_ra>
